<compile_context>
chip_gen: v5e
topology: v5e:2x2
jax: 0.10.0
libtpu: 0.0.40
codegen_flags: <defaults>
</compile_context>

<pallas_src>
import functools

import jax
import jax.numpy as jnp
from jax.experimental import pallas as pl
from jax.experimental.pallas import tpu as pltpu


def _round_up(n, m):
    return ((n + m - 1) // m) * m


def _qnet_kernel(x_ref, w1_ref, b1_ref, w2_ref, b2_ref, w3_ref, b3_ref, out_ref):
    # Layer 1: bf16 MXU matmul, f32 accumulation, f32 bias + ReLU epilogue (VPU).
    h1 = jnp.dot(x_ref[...], w1_ref[...], preferred_element_type=jnp.float32)
    h1 = jnp.maximum(h1 + b1_ref[...], 0.0)
    # Layer 2
    h2 = jnp.dot(h1.astype(w2_ref.dtype), w2_ref[...],
                 preferred_element_type=jnp.float32)
    h2 = jnp.maximum(h2 + b2_ref[...], 0.0)
    # Layer 3 (no activation)
    out = jnp.dot(h2.astype(w3_ref.dtype), w3_ref[...],
                  preferred_element_type=jnp.float32)
    out_ref[...] = (out + b3_ref[...]).astype(out_ref.dtype)


@functools.partial(jax.jit, static_argnames=("block_b",))
def qnetwork_forward(x, w1, b1, w2, b2, w3, b3, block_b=256):
    """Fused forward pass of QNetwork.

    x  : [B, input_size]           float32
    w1 : [input_size, hidden]      (pre-transposed vs. PyTorch [out, in] layout)
    b1 : [1, hidden]
    w2 : [hidden, hidden]
    b2 : [1, hidden]
    w3 : [hidden, output_size]
    b3 : [1, output_size]
    returns [B, output_size] float32
    """
    batch, in_f = x.shape
    hidden = w1.shape[1]
    out_f = w3.shape[1]

    # Pad feature dims to the 128-lane width; pad batch to the batch tile
    # (tile is a multiple of 16 so bf16 sublane packing is satisfied).
    in_p = _round_up(in_f, 128)
    hid_p = _round_up(hidden, 128)
    out_p = _round_up(out_f, 128)
    tb = min(block_b, _round_up(batch, 16))
    b_p = _round_up(batch, tb)

    def pad2(a, rows, cols, dtype):
        a = a.astype(dtype)
        return jnp.pad(a, ((0, rows - a.shape[0]), (0, cols - a.shape[1])))

    x_p = pad2(x, b_p, in_p, jnp.bfloat16)
    w1_p = pad2(w1, in_p, hid_p, jnp.bfloat16)
    w2_p = pad2(w2, hid_p, hid_p, jnp.bfloat16)
    w3_p = pad2(w3, hid_p, out_p, jnp.bfloat16)
    b1_p = pad2(b1, 1, hid_p, jnp.float32)
    b2_p = pad2(b2, 1, hid_p, jnp.float32)
    b3_p = pad2(b3, 1, out_p, jnp.float32)

    def resident(a):
        # Full-array block, same block index for every grid step -> stays in VMEM.
        return pl.BlockSpec(a.shape, lambda i: (0, 0))

    flops = 2 * batch * (in_f * hidden + hidden * hidden + hidden * out_f)
    bytes_accessed = (
        x_p.size * 2
        + (w1_p.size + w2_p.size + w3_p.size) * 2
        + (b1_p.size + b2_p.size + b3_p.size) * 4
        + b_p * out_p * 4
    )

    out_padded = pl.pallas_call(
        _qnet_kernel,
        out_shape=jax.ShapeDtypeStruct((b_p, out_p), jnp.float32),
        grid=(b_p // tb,),
        in_specs=[
            pl.BlockSpec((tb, in_p), lambda i: (i, 0)),   # x: streamed per batch tile
            resident(w1_p), resident(b1_p),               # weights/biases: VMEM-resident
            resident(w2_p), resident(b2_p),
            resident(w3_p), resident(b3_p),
        ],
        out_specs=pl.BlockSpec((tb, out_p), lambda i: (i, 0)),
        compiler_params=pltpu.CompilerParams(
            dimension_semantics=("parallel",)),
        cost_estimate=pl.CostEstimate(
            flops=flops, transcendentals=0, bytes_accessed=bytes_accessed),
    )(x_p, w1_p, b1_p, w2_p, b2_p, w3_p, b3_p)

    return out_padded[:batch, :out_f]


def init_qnetwork_params(key, input_size, output_size, hidden=256, dtype=jnp.float32):
    """Init matching PyTorch nn.Linear's uniform(-1/sqrt(fan_in), 1/sqrt(fan_in)).

    Weights are returned pre-transposed to [in, out] for the kernel.
    """
    keys = jax.random.split(key, 6)

    def lin(kw, kb, fan_in, fan_out):
        bound = 1.0 / jnp.sqrt(fan_in)
        w = jax.random.uniform(kw, (fan_in, fan_out), dtype, -bound, bound)
        b = jax.random.uniform(kb, (1, fan_out), dtype, -bound, bound)
        return w, b

    w1, b1 = lin(keys[0], keys[1], input_size, hidden)
    w2, b2 = lin(keys[2], keys[3], hidden, hidden)
    w3, b3 = lin(keys[4], keys[5], hidden, output_size)
    return w1, b1, w2, b2, w3, b3


def qnetwork_reference(x, w1, b1, w2, b2, w3, b3):
    """Plain-JAX reference mimicking the kernel's bf16-matmul / f32-epilogue split."""
    bf16, f32 = jnp.bfloat16, jnp.float32
    h1 = jnp.dot(x.astype(bf16), w1.astype(bf16), preferred_element_type=f32)
    h1 = jnp.maximum(h1 + b1, 0.0)
    h2 = jnp.dot(h1.astype(bf16), w2.astype(bf16), preferred_element_type=f32)
    h2 = jnp.maximum(h2 + b2, 0.0)
    return jnp.dot(h2.astype(bf16), w3.astype(bf16), preferred_element_type=f32) + b3


def qnetwork_reference_f32(x, w1, b1, w2, b2, w3, b3):
    h1 = jnp.maximum(x @ w1 + b1, 0.0)
    h2 = jnp.maximum(h1 @ w2 + b2, 0.0)
    return h2 @ w3 + b3


if __name__ == "__main__":
    # Small shapes consistent with QNetwork(input_size, output_size, hidden).
    batch = 8
    input_size = 16
    hidden = 32
    output_size = 4

    key = jax.random.PRNGKey(0)
    kx, kp, kx2 = jax.random.split(key, 3)

    x = jax.random.normal(kx, (batch, input_size), dtype=jnp.float32)
    params = init_qnetwork_params(kp, input_size, output_size, hidden=hidden)

    out = jax.block_until_ready(qnetwork_forward(x, *params))

    ref = qnetwork_reference(x, *params)
    ref_f32 = qnetwork_reference_f32(x, *params)
    assert out.shape == (batch, output_size), out.shape
    assert jnp.allclose(out, ref, atol=1e-4, rtol=1e-4), "mismatch vs bf16 reference"
    assert jnp.allclose(out, ref_f32, atol=5e-2, rtol=5e-2), "mismatch vs f32 reference"

    # Exercise the batch-tiled grid path (non-multiple-of-tile batch, grid > 1).
    x_big = jax.random.normal(kx2, (300, input_size), dtype=jnp.float32)
    out_big = jax.block_until_ready(qnetwork_forward(x_big, *params))
    ref_big = qnetwork_reference(x_big, *params)
    assert out_big.shape == (300, output_size), out_big.shape
    assert jnp.allclose(out_big, ref_big, atol=1e-4, rtol=1e-4), "tiled mismatch"

    print("KERNEL_OK")
</pallas_src>

<mosaic_0001>
module attributes {stable_mosaic.version = 11 : i64} {
  func.func @_qnet_kernel(%arg0: i32, %arg1: memref<16x128xbf16, #tpu.memory_space<vmem>>, %arg2: memref<128x128xbf16, #tpu.memory_space<vmem>>, %arg3: memref<1x128xf32, #tpu.memory_space<vmem>>, %arg4: memref<128x128xbf16, #tpu.memory_space<vmem>>, %arg5: memref<1x128xf32, #tpu.memory_space<vmem>>, %arg6: memref<128x128xbf16, #tpu.memory_space<vmem>>, %arg7: memref<1x128xf32, #tpu.memory_space<vmem>>, %arg8: memref<16x128xf32, #tpu.memory_space<vmem>>) attributes {dimension_semantics = [#tpu.dimension_semantics<parallel>], iteration_bounds = array<i64: 1>, scalar_prefetch = 0 : i64, scratch_operands = 0 : i64, tpu.core_type = #tpu.core_type<tc>, window_params = [{transform_indices = @transform_0, window_bounds = array<i64: 16, 128>}, {pipeline_mode = #tpu.pipeline_mode<synchronous>, transform_indices = @transform_1, window_bounds = array<i64: 128, 128>}, {pipeline_mode = #tpu.pipeline_mode<synchronous>, transform_indices = @transform_2, window_bounds = array<i64: 1, 128>}, {pipeline_mode = #tpu.pipeline_mode<synchronous>, transform_indices = @transform_3, window_bounds = array<i64: 128, 128>}, {pipeline_mode = #tpu.pipeline_mode<synchronous>, transform_indices = @transform_4, window_bounds = array<i64: 1, 128>}, {pipeline_mode = #tpu.pipeline_mode<synchronous>, transform_indices = @transform_5, window_bounds = array<i64: 128, 128>}, {pipeline_mode = #tpu.pipeline_mode<synchronous>, transform_indices = @transform_6, window_bounds = array<i64: 1, 128>}, {transform_indices = @transform_7, window_bounds = array<i64: 16, 128>}]} {
    %c0 = arith.constant 0 : index
    %c0_0 = arith.constant 0 : index
    %0 = vector.load %arg1[%c0, %c0_0] : memref<16x128xbf16, #tpu.memory_space<vmem>>, vector<16x128xbf16>
    %c0_1 = arith.constant 0 : index
    %c0_2 = arith.constant 0 : index
    %1 = vector.load %arg2[%c0_1, %c0_2] : memref<128x128xbf16, #tpu.memory_space<vmem>>, vector<128x128xbf16>
    %cst = arith.constant dense<0.000000e+00> : vector<16x128xf32>
    %2 = tpu.matmul %0, %1, %cst {dimension_numbers = #tpu.dot_dimension_numbers<[1], [0], [0], [1], [0, 0, 1, 1], [], []>} : vector<16x128xbf16>, vector<128x128xbf16>, vector<16x128xf32> -> vector<16x128xf32>
    %c0_3 = arith.constant 0 : index
    %c0_4 = arith.constant 0 : index
    %3 = vector.load %arg3[%c0_3, %c0_4] : memref<1x128xf32, #tpu.memory_space<vmem>>, vector<1x128xf32>
    %4 = vector.broadcast %3 : vector<1x128xf32> to vector<16x128xf32>
    %5 = arith.addf %2, %4 : vector<16x128xf32>
    %cst_5 = arith.constant 0.000000e+00 : f32
    %6 = vector.broadcast %cst_5 : f32 to vector<16x128xf32>
    %7 = arith.maximumf %5, %6 : vector<16x128xf32>
    %8 = arith.truncf %7 : vector<16x128xf32> to vector<16x128xbf16>
    %c0_6 = arith.constant 0 : index
    %c0_7 = arith.constant 0 : index
    %9 = vector.load %arg4[%c0_6, %c0_7] : memref<128x128xbf16, #tpu.memory_space<vmem>>, vector<128x128xbf16>
    %cst_8 = arith.constant dense<0.000000e+00> : vector<16x128xf32>
    %10 = tpu.matmul %8, %9, %cst_8 {dimension_numbers = #tpu.dot_dimension_numbers<[1], [0], [0], [1], [0, 0, 1, 1], [], []>} : vector<16x128xbf16>, vector<128x128xbf16>, vector<16x128xf32> -> vector<16x128xf32>
    %c0_9 = arith.constant 0 : index
    %c0_10 = arith.constant 0 : index
    %11 = vector.load %arg5[%c0_9, %c0_10] : memref<1x128xf32, #tpu.memory_space<vmem>>, vector<1x128xf32>
    %12 = vector.broadcast %11 : vector<1x128xf32> to vector<16x128xf32>
    %13 = arith.addf %10, %12 : vector<16x128xf32>
    %cst_11 = arith.constant 0.000000e+00 : f32
    %14 = vector.broadcast %cst_11 : f32 to vector<16x128xf32>
    %15 = arith.maximumf %13, %14 : vector<16x128xf32>
    %16 = arith.truncf %15 : vector<16x128xf32> to vector<16x128xbf16>
    %c0_12 = arith.constant 0 : index
    %c0_13 = arith.constant 0 : index
    %17 = vector.load %arg6[%c0_12, %c0_13] : memref<128x128xbf16, #tpu.memory_space<vmem>>, vector<128x128xbf16>
    %cst_14 = arith.constant dense<0.000000e+00> : vector<16x128xf32>
    %18 = tpu.matmul %16, %17, %cst_14 {dimension_numbers = #tpu.dot_dimension_numbers<[1], [0], [0], [1], [0, 0, 1, 1], [], []>} : vector<16x128xbf16>, vector<128x128xbf16>, vector<16x128xf32> -> vector<16x128xf32>
    %c0_15 = arith.constant 0 : index
    %c0_16 = arith.constant 0 : index
    %19 = vector.load %arg7[%c0_15, %c0_16] : memref<1x128xf32, #tpu.memory_space<vmem>>, vector<1x128xf32>
    %20 = vector.broadcast %19 : vector<1x128xf32> to vector<16x128xf32>
    %21 = arith.addf %18, %20 : vector<16x128xf32>
    %c0_17 = arith.constant 0 : index
    %c0_18 = arith.constant 0 : index
    %22 = vector.load %arg8[%c0_17, %c0_18] : memref<16x128xf32, #tpu.memory_space<vmem>>, vector<16x128xf32>
    tpu.vector_store %arg8[%c0_17, %c0_18], %21 {strides = array<i32>} : memref<16x128xf32, #tpu.memory_space<vmem>>, vector<16x128xf32>,
    return
  }
  func.func @transform_0(%arg0: i32) -> (i32, i32) {
    %c0_i32 = arith.constant 0 : i32
    %c0_i32_0 = arith.constant 0 : i32
    return %arg0, %c0_i32 : i32, i32
  }
  func.func @transform_1(%arg0: i32) -> (i32, i32) {
    %c0_i32 = arith.constant 0 : i32
    %c0_i32_0 = arith.constant 0 : i32
    %c0_i32_1 = arith.constant 0 : i32
    return %c0_i32, %c0_i32_0 : i32, i32
  }
  func.func @transform_2(%arg0: i32) -> (i32, i32) {
    %c0_i32 = arith.constant 0 : i32
    %c0_i32_0 = arith.constant 0 : i32
    %c0_i32_1 = arith.constant 0 : i32
    return %c0_i32, %c0_i32_0 : i32, i32
  }
  func.func @transform_3(%arg0: i32) -> (i32, i32) {
    %c0_i32 = arith.constant 0 : i32
    %c0_i32_0 = arith.constant 0 : i32
    %c0_i32_1 = arith.constant 0 : i32
    return %c0_i32, %c0_i32_0 : i32, i32
  }
  func.func @transform_4(%arg0: i32) -> (i32, i32) {
    %c0_i32 = arith.constant 0 : i32
    %c0_i32_0 = arith.constant 0 : i32
    %c0_i32_1 = arith.constant 0 : i32
    return %c0_i32, %c0_i32_0 : i32, i32
  }
  func.func @transform_5(%arg0: i32) -> (i32, i32) {
    %c0_i32 = arith.constant 0 : i32
    %c0_i32_0 = arith.constant 0 : i32
    %c0_i32_1 = arith.constant 0 : i32
    return %c0_i32, %c0_i32_0 : i32, i32
  }
  func.func @transform_6(%arg0: i32) -> (i32, i32) {
    %c0_i32 = arith.constant 0 : i32
    %c0_i32_0 = arith.constant 0 : i32
    %c0_i32_1 = arith.constant 0 : i32
    return %c0_i32, %c0_i32_0 : i32, i32
  }
  func.func @transform_7(%arg0: i32) -> (i32, i32) {
    %c0_i32 = arith.constant 0 : i32
    %c0_i32_0 = arith.constant 0 : i32
    return %arg0, %c0_i32 : i32, i32
  }
}

</mosaic_0001>

<bundles_post_ra>
// kernel: qnetwork_forward.1
= control target key start
LH: loop header
LB: loop body
LE: loop exit
PB: predicated region body
PF: predicated region fallthrough
CT: control target
= control target key end

     0   :  { %s550_s1 = inlined_call_operand.vmem [shape: bf16[128,128], index: 1, kind: input, shape index: {}]   ;;  %s551_s3 = inlined_call_operand.vmem [shape: bf16[128,128], index: 3, kind: input, shape index: {}]   ;;  %s552_s2 = inlined_call_operand.vmem [shape: f32[1,128], index: 2, kind: input, shape index: {}]   ;;  %s553_s0 = inlined_call_operand.vmem [shape: bf16[16,128], index: 0, kind: input, shape index: {}]   ;;  %s554_s4 = inlined_call_operand.vmem [shape: f32[1,128], index: 4, kind: input, shape index: {}]   ;;  %s555_s5 = inlined_call_operand.vmem [shape: bf16[128,128], index: 5, kind: input, shape index: {}]   ;;  %s556_s6 = inlined_call_operand.vmem [shape: f32[1,128], index: 6, kind: input, shape index: {}]   ;;  %s557_s7 = inlined_call_operand.vmem [shape: f32[16,128], index: 7, kind: output, shape index: {}]  }
   0x1   :  { %v400_v0 = vld [vmem:[%s550_s1 + $0x38] sm:$0xff]  ;;  %v399_v1 = vld [vmem:[%s550_s1 + $0x30] sm:$0xff]  ;;  %v398_v4 = vld [vmem:[%s550_s1 + $0x28] sm:$0xff] }
   0x2   :  { %102 = vmatpush.bf16.msra.mxu0 %v400_v0  ;;  %v408_v2 = vld [vmem:[%s551_s3 + $0x38] sm:$0xff]  ;;  %v407_v3 = vld [vmem:[%s551_s3 + $0x30] sm:$0xff]  ;;  %v406_v5 = vld [vmem:[%s551_s3 + $0x28] sm:$0xff] }
   0x3   :  { %187 = vmatpush.bf16.msra.mxu1 %v408_v2  ;;  %v397_v6 = vld [vmem:[%s550_s1 + $0x20] sm:$0xff]  ;;  %v396_v8 = vld [vmem:[%s550_s1 + $0x18] sm:$0xff]  ;;  %v395_v9 = vld [vmem:[%s550_s1 + $0x10] sm:$0xff] }
   0x4   :  { %v405_v7 = vld [vmem:[%s551_s3 + $0x20] sm:$0xff]  ;;  %v394_v10 = vld [vmem:[%s550_s1 + $0x8] sm:$0xff]  ;;  %v404_v13 = vld [vmem:[%s551_s3 + $0x18] sm:$0xff] }
   0x5   :  { %v393_v11 = vld [vmem:[%s550_s1] sm:$0xff]  ;;  %v403_v14 = vld [vmem:[%s551_s3 + $0x10] sm:$0xff]  ;;  %v402_v15 = vld [vmem:[%s551_s3 + $0x8] sm:$0xff] }
   0x6   :  { %103 = vmatpush.bf16.msra.mxu0 %v399_v1  ;;  %v392_v12 = vld [vmem:[%s553_s0] sm:$0xff]  ;;  %v416_v17 = vld [vmem:[%s555_s5 + $0x38] sm:$0xff]  ;;  %v415_v18 = vld [vmem:[%s555_s5 + $0x30] sm:$0xff] }
   0x7   :  { %188 = vmatpush.bf16.msra.mxu1 %v407_v3  ;;  %v401_v16 = vld [vmem:[%s551_s3] sm:$0xff]  ;;  %272 = vmatpush.bf16.msra.mxu2 %v416_v17  ;;  %v414_v19 = vld [vmem:[%s555_s5 + $0x28] sm:$0xff]  ;;  %v412_v29 = vld [vmem:[%s555_s5 + $0x18] sm:$0xff] }
   0x8   :  { %v413_v20 = vld [vmem:[%s555_s5 + $0x20] sm:$0xff]  ;;  %v411_v30 = vld [vmem:[%s555_s5 + $0x10] sm:$0xff]  ;;  %v410_v31 = vld [vmem:[%s555_s5 + $0x8] sm:$0xff] }
   0x9   :  { %v417_v22 = vld [vmem:[%s552_s2] ss:$0 sm:$0xff] }
   0xa   :  { %104 = vmatpush.bf16.msra.mxu0 %v398_v4  ;;  %v409_v32 = vld [vmem:[%s555_s5] sm:$0xff] }
   0xb   :  { %189 = vmatpush.bf16.msra.mxu1 %v406_v5  ;;  %273 = vmatpush.bf16.msra.mxu2 %v415_v18  ;;  %v418_v34 = vld [vmem:[%s554_s4] ss:$0 sm:$0xff] }
   0xc   :  { %v419_v41 = vld [vmem:[%s556_s6] ss:$0 sm:$0xff] }
   0xe   :  { %105 = vmatpush.bf16.msra.mxu0 %v397_v6 }
   0xf   :  { %190 = vmatpush.bf16.msra.mxu1 %v405_v7  ;;  %274 = vmatpush.bf16.msra.mxu2 %v414_v19 }
  0x12   :  { %106 = vmatpush.bf16.msra.mxu0 %v396_v8 }
  0x13   :  { %191 = vmatpush.bf16.msra.mxu1 %v404_v13  ;;  %275 = vmatpush.bf16.msra.mxu2 %v413_v20 }
  0x16   :  { %107 = vmatpush.bf16.msra.mxu0 %v395_v9 }
  0x17   :  { %192 = vmatpush.bf16.msra.mxu1 %v403_v14  ;;  %276 = vmatpush.bf16.msra.mxu2 %v412_v29 }
  0x1a   :  { %108 = vmatpush.bf16.msra.mxu0 %v394_v10 }
  0x1b   :  { %193 = vmatpush.bf16.msra.mxu1 %v402_v15  ;;  %277 = vmatpush.bf16.msra.mxu2 %v411_v30 }
  0x1e   :  { %109 = vmatpush.bf16.msra.mxu0 %v393_v11 }
  0x1f   :  { %194 = vmatpush.bf16.msra.mxu1 %v401_v16  ;;  %278 = vmatpush.bf16.msra.mxu2 %v410_v31 }
  0x21   :  { %110 = vmatmul.bf16.vlgmr.msra.gmra.mxu0 %v392_v12 }
  0x23   :  { %279 = vmatpush.bf16.msra.mxu2 %v409_v32 }
  0x9e   :  { %v111_v21 = vpop.f32.mrf.mxu0 }
  0x9f   :  { %v112_v23 = vadd.f32 %v417_v22, %v111_v21 }
  0xa1   :  { %v116_v26 = vmax.f32 %v112_v23, 0.0 }
  0xa6   :  { %v113_v24 = vpop.f32.mrf.mxu0 }
  0xa7   :  { %v114_v25 = vadd.f32 %v417_v22, %v113_v24 }
  0xa9   :  { %v117_v27 = vmax.f32 %v114_v25, 0.0 }
  0xab   :  { %v118_v28 = vpack.c.bf16 %v117_v27, %v116_v26 }
  0xad   :  { %195 = vmatmul.bf16.vlgmr.msra.gmra.mxu1 %v118_v28 }
 0x12a   :  { %v196_v33 = vpop.f32.mrf.mxu1 }
 0x12b   :  { %v197_v35 = vadd.f32 %v418_v34, %v196_v33 }
 0x12d   :  { %v201_v38 = vmax.f32 %v197_v35, 0.0 }
 0x132   :  { %v198_v36 = vpop.f32.mrf.mxu1 }
 0x133   :  { %v199_v37 = vadd.f32 %v418_v34, %v198_v36 }
 0x135   :  { %v202_v39 = vmax.f32 %v199_v37, 0.0 }
 0x137   :  { %v203_v40 = vpack.c.bf16 %v202_v39, %v201_v38 }
 0x139   :  { %280 = vmatmul.bf16.vlgmr.msra.gmra.mxu2 %v203_v40 }
 0x1bc   :  { %v281_v42 = vpop.f32.mrf.mxu2 }
 0x1bd   :  { %v282_v43 = vadd.f32 %v419_v41, %v281_v42 }
 0x1bf   :  { %286 = vst [vmem:[%s557_s7] sm:$0xff] %v282_v43 }
 0x1c4   :  { %v283_v44 = vpop.f32.mrf.mxu2 }
 0x1c5   :  { %v284_v45 = vadd.f32 %v419_v41, %v283_v44 }
 0x1c7   :  { %287 = vst [vmem:[%s557_s7 + $0x8] sm:$0xff] %v284_v45 }

</bundles_post_ra>
